<compile_context>
chip_gen: v7x
topology: tpu7x:2x2x1
jax: 0.10.0
libtpu: 0.0.40
codegen_flags: <defaults>
</compile_context>

<pallas_src>
import jax
import jax.numpy as jnp
from jax import lax
from jax.experimental import pallas as pl
from jax.experimental.pallas import tpu as pltpu


def _round_up(x, mult):
    return ((x + mult - 1) // mult) * mult


def one_layer_kernel(x_ref, w_ref, p_ref, o_ref):
    # Linear: y = x @ W^T + bias.  w_ref is (m_out, m_in) (PyTorch layout);
    # contract x's axis 1 with w's axis 1 -> (tile_b, m_out); f32 accumulation.
    y = lax.dot_general(
        x_ref[...], w_ref[...],
        dimension_numbers=(((1,), (1,)), ((), ())),
        preferred_element_type=jnp.float32)

    bias = p_ref[0:1, :]          # rows of the packed (8, m) f32 param tile
    a = p_ref[1:2, :]
    b = p_ref[2:3, :]
    c = p_ref[3:4, :]
    d = p_ref[4:5, :]

    y = y + bias
    # raf activation, Horner form:  y*(a + b*y) + c*sin(d*y)
    out = y * (a + b * y) + c * jnp.sin(d * y)
    o_ref[...] = out.astype(o_ref.dtype)


def _build_call(batch_pad, m, tile_b, out_dtype, *, single_buffer_invariants):
    inv_kw = {}
    if single_buffer_invariants:
        # Weight / params never change across the grid; one VMEM buffer suffices.
        inv_kw = dict(pipeline_mode=pl.Buffered(1))

    row_spec = pl.BlockSpec((tile_b, m), lambda i: (i, 0))
    w_spec = pl.BlockSpec((m, m), lambda i: (0, 0), **inv_kw)
    p_spec = pl.BlockSpec((8, m), lambda i: (0, 0), **inv_kw)

    return pl.pallas_call(
        one_layer_kernel,
        out_shape=jax.ShapeDtypeStruct((batch_pad, m), out_dtype),
        grid_spec=pltpu.PrefetchScalarGridSpec(
            num_scalar_prefetch=0,
            grid=(batch_pad // tile_b,),
            in_specs=[row_spec, w_spec, p_spec],
            out_specs=row_spec,
        ),
        compiler_params=pltpu.CompilerParams(
            dimension_semantics=("parallel",),
            vmem_limit_bytes=64 * 1024 * 1024,
        ),
    )


def one_layer_forward(x, weight, bias, a, b, c, d, *, matmul_dtype=jnp.bfloat16):
    """x: (B, m); weight: (m, m) in PyTorch (out, in) layout; bias: (m,);
    a, b, c, d: (1, m) raf params.  Returns (B, m) in x.dtype."""
    B, m = x.shape
    assert weight.shape == (m, m)

    # --- batch tiling: large, sublane-aligned tiles; >=2 grid steps when big ---
    align = 16 if matmul_dtype == jnp.bfloat16 else 8
    b_al = _round_up(B, align)
    if b_al <= 256:
        tile_b = b_al
    else:
        n_tiles = max(2, pl.cdiv(b_al, 256))      # >=2 steps -> both v7x TCs busy
        tile_b = _round_up(pl.cdiv(b_al, n_tiles), align)
    grid_b = pl.cdiv(b_al, tile_b)
    b_pad = grid_b * tile_b

    # --- operand prep: stream x / W in bf16, no W.T copy in HBM ---
    x_in = x.astype(matmul_dtype)
    if b_pad != B:
        x_in = jnp.zeros((b_pad, m), matmul_dtype).at[:B].set(x_in)
    w_in = weight.astype(matmul_dtype)

    # Pack bias + raf params into one (8, m) f32 tile (rows 5..7 are padding).
    params = jnp.concatenate(
        [bias.reshape(1, m).astype(jnp.float32),
         a.reshape(1, m).astype(jnp.float32),
         b.reshape(1, m).astype(jnp.float32),
         c.reshape(1, m).astype(jnp.float32),
         d.reshape(1, m).astype(jnp.float32),
         jnp.zeros((3, m), jnp.float32)], axis=0)

    # TODO(synk): for very large m (weight residency approaching the VMEM limit,
    # esp. v7x's 64 MiB/TC) add N- and K-tiling grid axes with a f32 VMEM
    # accumulator (pl.when init/finalize) instead of a full-weight block.

    try:
        call = _build_call(b_pad, m, tile_b, x.dtype, single_buffer_invariants=True)
        out = call(x_in, w_in, params)
    except Exception:
        # pipeline_mode=pl.Buffered(1) not supported here -> default buffering.
        call = _build_call(b_pad, m, tile_b, x.dtype, single_buffer_invariants=False)
        out = call(x_in, w_in, params)

    return out[:B] if b_pad != B else out


def reference_forward(x, weight, bias, a, b, c, d):
    y = x @ weight.T + bias
    return y * a + b * y ** 2 + c * jnp.sin(d * y)


if __name__ == "__main__":
    key = jax.random.PRNGKey(0)
    B, m = 16, 128  # small batch, m = feature width (lane-aligned)

    k_x, k_w, k_bias, k_a, k_b, k_c, k_d = jax.random.split(key, 7)

    x = jax.random.normal(k_x, (B, m), dtype=jnp.float32)

    # nn.Linear(m, m) init: uniform(-1/sqrt(m), 1/sqrt(m)) for weight & bias
    bound = 1.0 / (m ** 0.5)
    weight = jax.random.uniform(k_w, (m, m), minval=-bound, maxval=bound,
                                dtype=jnp.float32)
    bias = jax.random.uniform(k_bias, (m,), minval=-bound, maxval=bound,
                              dtype=jnp.float32)

    # sin_poly2_params init: a~N(0,0.01), b~N(0,0.01), c~N(1,0.01), d~N(1,0.01)
    a = 0.0 + 0.01 * jax.random.normal(k_a, (1, m), dtype=jnp.float32)
    b = 0.0 + 0.01 * jax.random.normal(k_b, (1, m), dtype=jnp.float32)
    c = 1.0 + 0.01 * jax.random.normal(k_c, (1, m), dtype=jnp.float32)
    d = 1.0 + 0.01 * jax.random.normal(k_d, (1, m), dtype=jnp.float32)

    out = one_layer_forward(x, weight, bias, a, b, c, d)
    out = jax.block_until_ready(out)

    # Reference using the same bf16-rounded matmul inputs (f32 accumulation),
    # so the check verifies the kernel math exactly.
    x_r = x.astype(jnp.bfloat16).astype(jnp.float32)
    w_r = weight.astype(jnp.bfloat16).astype(jnp.float32)
    ref = reference_forward(x_r, w_r, bias, a, b, c, d)

    assert out.shape == (B, m)
    assert out.dtype == x.dtype
    assert jnp.allclose(out, ref, atol=2e-4, rtol=2e-4), "mismatch vs reference"

    print("KERNEL_OK")
</pallas_src>

<mosaic_0001>
module attributes {stable_mosaic.version = 11 : i64} {
  func.func @one_layer_kernel(%arg0: i32, %arg1: memref<16x128xbf16, #tpu.memory_space<vmem>>, %arg2: memref<128x128xbf16, #tpu.memory_space<vmem>>, %arg3: memref<8x128xf32, #tpu.memory_space<vmem>>, %arg4: memref<16x128xf32, #tpu.memory_space<vmem>>) attributes {dimension_semantics = [#tpu.dimension_semantics<parallel>], iteration_bounds = array<i64: 1>, scalar_prefetch = 0 : i64, scratch_operands = 0 : i64, tpu.core_type = #tpu.core_type<tc>, window_params = [{transform_indices = @transform_0, window_bounds = array<i64: 16, 128>}, {pipeline_mode = #tpu.pipeline_mode<synchronous>, transform_indices = @transform_1, window_bounds = array<i64: 128, 128>}, {pipeline_mode = #tpu.pipeline_mode<synchronous>, transform_indices = @transform_2, window_bounds = array<i64: 8, 128>}, {transform_indices = @transform_3, window_bounds = array<i64: 16, 128>}]} {
    %c0 = arith.constant 0 : index
    %c0_0 = arith.constant 0 : index
    %0 = vector.load %arg1[%c0, %c0_0] : memref<16x128xbf16, #tpu.memory_space<vmem>>, vector<16x128xbf16>
    %c0_1 = arith.constant 0 : index
    %c0_2 = arith.constant 0 : index
    %1 = vector.load %arg2[%c0_1, %c0_2] : memref<128x128xbf16, #tpu.memory_space<vmem>>, vector<128x128xbf16>
    %cst = arith.constant dense<0.000000e+00> : vector<16x128xf32>
    %2 = tpu.matmul %0, %1, %cst {dimension_numbers = #tpu.dot_dimension_numbers<[1], [1], [0], [0], [0, 0, 1, 0], [], []>} : vector<16x128xbf16>, vector<128x128xbf16>, vector<16x128xf32> -> vector<16x128xf32>
    %c0_3 = arith.constant 0 : index
    %c0_4 = arith.constant 0 : index
    %3 = vector.load %arg3[%c0_3, %c0_4] : memref<8x128xf32, #tpu.memory_space<vmem>>, vector<1x128xf32>
    %c1 = arith.constant 1 : index
    %c0_5 = arith.constant 0 : index
    %4 = vector.load %arg3[%c1, %c0_5] : memref<8x128xf32, #tpu.memory_space<vmem>>, vector<1x128xf32>
    %c2 = arith.constant 2 : index
    %c0_6 = arith.constant 0 : index
    %5 = vector.load %arg3[%c2, %c0_6] : memref<8x128xf32, #tpu.memory_space<vmem>>, vector<1x128xf32>
    %c3 = arith.constant 3 : index
    %c0_7 = arith.constant 0 : index
    %6 = vector.load %arg3[%c3, %c0_7] : memref<8x128xf32, #tpu.memory_space<vmem>>, vector<1x128xf32>
    %c4 = arith.constant 4 : index
    %c0_8 = arith.constant 0 : index
    %7 = vector.load %arg3[%c4, %c0_8] : memref<8x128xf32, #tpu.memory_space<vmem>>, vector<1x128xf32>
    %8 = vector.broadcast %3 : vector<1x128xf32> to vector<16x128xf32>
    %9 = arith.addf %2, %8 : vector<16x128xf32>
    %10 = vector.broadcast %5 : vector<1x128xf32> to vector<16x128xf32>
    %11 = arith.mulf %10, %9 : vector<16x128xf32>
    %12 = vector.broadcast %4 : vector<1x128xf32> to vector<16x128xf32>
    %13 = arith.addf %12, %11 : vector<16x128xf32>
    %14 = arith.mulf %9, %13 : vector<16x128xf32>
    %15 = vector.broadcast %7 : vector<1x128xf32> to vector<16x128xf32>
    %16 = arith.mulf %15, %9 : vector<16x128xf32>
    %17 = math.sin %16 : vector<16x128xf32>
    %18 = vector.broadcast %6 : vector<1x128xf32> to vector<16x128xf32>
    %19 = arith.mulf %18, %17 : vector<16x128xf32>
    %20 = arith.addf %14, %19 : vector<16x128xf32>
    %c0_9 = arith.constant 0 : index
    %c0_10 = arith.constant 0 : index
    %21 = vector.load %arg4[%c0_9, %c0_10] : memref<16x128xf32, #tpu.memory_space<vmem>>, vector<16x128xf32>
    tpu.vector_store %arg4[%c0_9, %c0_10], %20 {strides = array<i32>} : memref<16x128xf32, #tpu.memory_space<vmem>>, vector<16x128xf32>,
    return
  }
  func.func @transform_0(%arg0: i32) -> (i32, i32) {
    %c0_i32 = arith.constant 0 : i32
    %c0_i32_0 = arith.constant 0 : i32
    return %arg0, %c0_i32 : i32, i32
  }
  func.func @transform_1(%arg0: i32) -> (i32, i32) {
    %c0_i32 = arith.constant 0 : i32
    %c0_i32_0 = arith.constant 0 : i32
    %c0_i32_1 = arith.constant 0 : i32
    return %c0_i32, %c0_i32_0 : i32, i32
  }
  func.func @transform_2(%arg0: i32) -> (i32, i32) {
    %c0_i32 = arith.constant 0 : i32
    %c0_i32_0 = arith.constant 0 : i32
    %c0_i32_1 = arith.constant 0 : i32
    return %c0_i32, %c0_i32_0 : i32, i32
  }
  func.func @transform_3(%arg0: i32) -> (i32, i32) {
    %c0_i32 = arith.constant 0 : i32
    %c0_i32_0 = arith.constant 0 : i32
    return %arg0, %c0_i32 : i32, i32
  }
}

module attributes {stable_mosaic.version = 11 : i64} {
  func.func @one_layer_kernel(%arg0: i32, %arg1: memref<16x128xbf16, #tpu.memory_space<vmem>>, %arg2: memref<128x128xbf16, #tpu.memory_space<vmem>>, %arg3: memref<8x128xf32, #tpu.memory_space<vmem>>, %arg4: memref<16x128xf32, #tpu.memory_space<vmem>>) attributes {dimension_semantics = [#tpu.dimension_semantics<parallel>], iteration_bounds = array<i64: 1>, scalar_prefetch = 0 : i64, scratch_operands = 0 : i64, tpu.core_type = #tpu.core_type<tc>, window_params = [{transform_indices = @transform_0, window_bounds = array<i64: 16, 128>}, {pipeline_mode = #tpu.pipeline_mode<synchronous>, transform_indices = @transform_1, window_bounds = array<i64: 128, 128>}, {pipeline_mode = #tpu.pipeline_mode<synchronous>, transform_indices = @transform_2, window_bounds = array<i64: 8, 128>}, {transform_indices = @transform_3, window_bounds = array<i64: 16, 128>}]} {
    %c0 = arith.constant 0 : index
    %c0_0 = arith.constant 0 : index
    %0 = vector.load %arg1[%c0, %c0_0] : memref<16x128xbf16, #tpu.memory_space<vmem>>, vector<16x128xbf16>
    %c0_1 = arith.constant 0 : index
    %c0_2 = arith.constant 0 : index
    %1 = vector.load %arg2[%c0_1, %c0_2] : memref<128x128xbf16, #tpu.memory_space<vmem>>, vector<128x128xbf16>
    %cst = arith.constant dense<0.000000e+00> : vector<16x128xf32>
    %2 = tpu.matmul %0, %1, %cst {dimension_numbers = #tpu.dot_dimension_numbers<[1], [1], [0], [0], [0, 0, 1, 0], [], []>} : vector<16x128xbf16>, vector<128x128xbf16>, vector<16x128xf32> -> vector<16x128xf32>
    %c0_3 = arith.constant 0 : index
    %c0_4 = arith.constant 0 : index
    %3 = vector.load %arg3[%c0_3, %c0_4] : memref<8x128xf32, #tpu.memory_space<vmem>>, vector<1x128xf32>
    %c1 = arith.constant 1 : index
    %c0_5 = arith.constant 0 : index
    %4 = vector.load %arg3[%c1, %c0_5] : memref<8x128xf32, #tpu.memory_space<vmem>>, vector<1x128xf32>
    %c2 = arith.constant 2 : index
    %c0_6 = arith.constant 0 : index
    %5 = vector.load %arg3[%c2, %c0_6] : memref<8x128xf32, #tpu.memory_space<vmem>>, vector<1x128xf32>
    %c3 = arith.constant 3 : index
    %c0_7 = arith.constant 0 : index
    %6 = vector.load %arg3[%c3, %c0_7] : memref<8x128xf32, #tpu.memory_space<vmem>>, vector<1x128xf32>
    %c4 = arith.constant 4 : index
    %c0_8 = arith.constant 0 : index
    %7 = vector.load %arg3[%c4, %c0_8] : memref<8x128xf32, #tpu.memory_space<vmem>>, vector<1x128xf32>
    %8 = vector.broadcast %3 : vector<1x128xf32> to vector<16x128xf32>
    %9 = arith.addf %2, %8 : vector<16x128xf32>
    %10 = vector.broadcast %5 : vector<1x128xf32> to vector<16x128xf32>
    %11 = arith.mulf %10, %9 : vector<16x128xf32>
    %12 = vector.broadcast %4 : vector<1x128xf32> to vector<16x128xf32>
    %13 = arith.addf %12, %11 : vector<16x128xf32>
    %14 = arith.mulf %9, %13 : vector<16x128xf32>
    %15 = vector.broadcast %7 : vector<1x128xf32> to vector<16x128xf32>
    %16 = arith.mulf %15, %9 : vector<16x128xf32>
    %17 = math.sin %16 : vector<16x128xf32>
    %18 = vector.broadcast %6 : vector<1x128xf32> to vector<16x128xf32>
    %19 = arith.mulf %18, %17 : vector<16x128xf32>
    %20 = arith.addf %14, %19 : vector<16x128xf32>
    %c0_9 = arith.constant 0 : index
    %c0_10 = arith.constant 0 : index
    %21 = vector.load %arg4[%c0_9, %c0_10] : memref<16x128xf32, #tpu.memory_space<vmem>>, vector<16x128xf32>
    tpu.vector_store %arg4[%c0_9, %c0_10], %20 {strides = array<i32>} : memref<16x128xf32, #tpu.memory_space<vmem>>, vector<16x128xf32>,
    return
  }
  func.func @transform_0(%arg0: i32) -> (i32, i32) {
    %c0_i32 = arith.constant 0 : i32
    %c0_i32_0 = arith.constant 0 : i32
    return %arg0, %c0_i32 : i32, i32
  }
  func.func @transform_1(%arg0: i32) -> (i32, i32) {
    %c0_i32 = arith.constant 0 : i32
    %c0_i32_0 = arith.constant 0 : i32
    %c0_i32_1 = arith.constant 0 : i32
    return %c0_i32, %c0_i32_0 : i32, i32
  }
  func.func @transform_2(%arg0: i32) -> (i32, i32) {
    %c0_i32 = arith.constant 0 : i32
    %c0_i32_0 = arith.constant 0 : i32
    %c0_i32_1 = arith.constant 0 : i32
    return %c0_i32, %c0_i32_0 : i32, i32
  }
  func.func @transform_3(%arg0: i32) -> (i32, i32) {
    %c0_i32 = arith.constant 0 : i32
    %c0_i32_0 = arith.constant 0 : i32
    return %arg0, %c0_i32 : i32, i32
  }
}

</mosaic_0001>

<bundles_post_ra>
// kernel: tpu_custom_call.1
= control target key start
LH: loop header
LB: loop body
LE: loop exit
PB: predicated region body
PF: predicated region fallthrough
CT: control target
= control target key end

     0   :  { %8 = vsyncpa [#allocation3], 0  ;;  %s789_s0 = inlined_call_operand.hbm [shape: bf16[16,128], index: 0, kind: input, shape index: {}]   ;;  %s790_s1 = inlined_call_operand.hbm [shape: bf16[128,128], index: 1, kind: input, shape index: {}]   ;;  %s791_s2 = inlined_call_operand.hbm [shape: f32[8,128], index: 2, kind: input, shape index: {}]   ;;  %s792_s3 = inlined_call_operand.hbm [shape: f32[16,128], index: 3, kind: output, shape index: {}]  }
   0x1   :  { %9 = vsyncpa [#allocation6], 0 }
   0x2   :  { %10 = vsyncpa [#allocation4], 0  ;;  %s619_s12 = smov [#allocation5]   ;;  %s620_s14 = smov [#allocation2]  }
   0x3   :  { %s28_s13 = sshll.u32 %s619_s12, 4  ;;  %s16_s15 = sshll.u32 %s620_s14, 4  ;;  %s29_s13 = int_to_ptr.vmem [resolvable:$true] %s28_s13  ;;  %s655_s15 = int_to_ptr.vmem [resolvable:$true] %s16_s15 }
   0x4   :  { %s525_s18 = scalar_lea.hbm %s790_s1, 1024 }
   0x5   :  { %p526_p0 = scmp.ne.s32.totalorder %s790_s1, %s525_s18  ;;  %p529_p1 = scmp.lt.u32.totalorder %s525_s18, %s790_s1 }
   0x7   :  { %p531_p2 = pnand %p529_p1, %p526_p0 }
   0x9   :  { %534 = shalt.err (!%p531_p2)
}
   0xa   :  { %s535_s23 = scalar_lea.vmem %s29_s13, 1024  ;;  %p540_p4 = scmp.lt.s32.totalorder %s29_s13, %s29_s13 }
   0xb   :  { %p536_p3 = scmp.ne.s32.totalorder %s29_s13, %s535_s23  ;;  %p541_p5 = scmp.lt.s32.totalorder %s535_s23, %s535_s23 }
   0xd   :  { %p542_p6 = por %p541_p5, %p540_p4 }
   0xf   :  { %p543_p7 = pnand %p542_p6, %p536_p3 }
  0x11   :  { %546 = shalt.err (!%p543_p7)
}
  0x12   :  { %s621_s24 = smov 64   ;;  %s622_s25 = smov 4  }
  0x13   :  { %34 = dma.hbm_to_vmem [thread:$0]  %s790_s1, 1024, %s29_s13, [#allocation6], %s621_s24, %s621_s24, %s622_s25  }
  0x14   :  { %s547_s30 = scalar_lea.hbm %s789_s0, 128 }
  0x15   :  { %p548_p8 = scmp.ne.s32.totalorder %s789_s0, %s547_s30  ;;  %p551_p9 = scmp.lt.u32.totalorder %s547_s30, %s789_s0 }
  0x17   :  { %p553_p10 = pnand %p551_p9, %p548_p8 }
  0x19   :  { %556 = shalt.err (!%p553_p10)
}
  0x1a   :  { %s557_s8 = scalar_lea.vmem %s655_s15, 128  ;;  %p562_p12 = scmp.lt.s32.totalorder %s655_s15, %s655_s15 }
  0x1b   :  { %p558_p11 = scmp.ne.s32.totalorder %s655_s15, %s557_s8  ;;  %p563_p13 = scmp.lt.s32.totalorder %s557_s8, %s557_s8 }
  0x1d   :  { %p564_p0 = por %p563_p13, %p562_p12 }
  0x1f   :  { %p565_p1 = pnand %p564_p0, %p558_p11 }
  0x21   :  { %568 = shalt.err (!%p565_p1)
}
  0x22   :  { %22 = dma.hbm_to_vmem [thread:$0]  %s789_s0, 128, %s655_s15, [#allocation3], %s621_s24, %s621_s24, %s622_s25  }
  0x23   :  { %s623_s10 = smov [#allocation7]   ;;  %s569_s14 = scalar_lea.hbm %s791_s2, 128 }
  0x24   :  { %s41_s11 = sshll.u32 %s623_s10, 4  ;;  %p570_p2 = scmp.ne.s32.totalorder %s791_s2, %s569_s14  ;;  %s42_s11 = int_to_ptr.vmem [resolvable:$true] %s41_s11 }
  0x25   :  { %p573_p3 = scmp.lt.u32.totalorder %s569_s14, %s791_s2 }
  0x27   :  { %p575_p4 = pnand %p573_p3, %p570_p2 }
  0x29   :  { %578 = shalt.err (!%p575_p4)
}
  0x2a   :  { %s579_s20 = scalar_lea.vmem %s42_s11, 128  ;;  %p584_p6 = scmp.lt.s32.totalorder %s42_s11, %s42_s11 }
  0x2b   :  { %p580_p5 = scmp.ne.s32.totalorder %s42_s11, %s579_s20  ;;  %p585_p7 = scmp.lt.s32.totalorder %s579_s20, %s579_s20 }
  0x2d   :  { %p586_p8 = por %p585_p7, %p584_p6 }
  0x2f   :  { %p587_p9 = pnand %p586_p8, %p580_p5 }
  0x31   :  { %590 = shalt.err (!%p587_p9)
}
  0x32   :  { %44 = dma.hbm_to_vmem [thread:$0]  %s791_s2, 128, %s42_s11, [#allocation6]  }
  0x33   :  { %613 = dma.done.wait [#allocation3], 128  }
  0x34   :  { %614 = vsyncadd [#allocation3], 4294967168 }
  0x35   :  { %615 = dma.done.wait [#allocation6], 1152  }
  0x36   :  { %616 = vsyncadd [#allocation6], 4294966144  ;;  %v624_v0 = vmov 0.0   ;;  %vm625_vm0 = vmmov 0   ;;  %v508_v1 = vld [vmem:[#allocation5] sm:$0xff]   ;;  %v509_v2 = vld [vmem:[#allocation5 + $0x8] sm:$0xff]  }
  0x37   :  { %464 = vmatprep.subr.bf16.mxu0 %v624_v0  ;;  %480 = vmatprep.mubr.msk.bf16.mxu0 %vm625_vm0, %v624_v0  ;;  %v510_v3 = vld [vmem:[#allocation5 + $0x10] sm:$0xff]   ;;  %v511_v4 = vld [vmem:[#allocation5 + $0x18] sm:$0xff]   ;;  %v512_v5 = vld [vmem:[#allocation5 + $0x20] sm:$0xff]   ;;  %v626_v38 = vmov 683565275   ;;  %s632_s2 = smov [#allocation8]  }
  0x38   :  { %465 = vmatpush3.bf16.xpose.msra.mxu0 %v508_v1  ;;  %v513_v6 = vld [vmem:[#allocation5 + $0x28] sm:$0xff]   ;;  %v514_v7 = vld [vmem:[#allocation5 + $0x30] sm:$0xff]   ;;  %v515_v8 = vld [vmem:[#allocation5 + $0x38] sm:$0xff]   ;;  %v627_v41 = vmov 2475754826   ;;  %s420_s21 = sshll.u32 %s632_s2, 4  ;;  %s421_s21 = int_to_ptr.vmem [resolvable:$true] %s420_s21 }
  0x39   :  { %466 = vmatprep.subr.bf16.mxu0 %v624_v0  ;;  %v516_v9 = vld [vmem:[#allocation2] sm:$0xff]   ;;  %v433_v10 = vld [vmem:[#allocation7] ss:$0 sm:$0xff]  ;;  %v445_v11 = vld [vmem:[#allocation7 + $0x4] ss:$0 sm:$0xff]  ;;  %s591_s22 = scalar_lea.vmem %s421_s21, 256  ;;  %p596_p11 = scmp.lt.s32.totalorder %s421_s21, %s421_s21 }
  0x3a   :  { %v628_v43 = vmov 2131351028   ;;  %v629_v45 = vmov 2102212464   ;;  %v630_v47 = vmov 920167782   ;;  %p592_p10 = scmp.ne.s32.totalorder %s421_s21, %s591_s22  ;;  %p597_p12 = scmp.lt.s32.totalorder %s591_s22, %s591_s22 }
  0x3b   :  { %v631_v54 = vmov 1326507024  }
  0x3c   :  { %p598_p13 = por %p597_p12, %p596_p11 }
  0x3e   :  { %p599_p0 = pnand %p598_p13, %p592_p10 }
  0x40   :  { %467 = vmatpush3.bf16.xpose.msra.mxu0 %v509_v2 }
  0x41   :  { %468 = vmatprep.subr.bf16.mxu0 %v624_v0 }
  0x48   :  { %469 = vmatpush3.bf16.xpose.msra.mxu0 %v510_v3 }
  0x49   :  { %470 = vmatprep.subr.bf16.mxu0 %v624_v0 }
  0x50   :  { %471 = vmatpush3.bf16.xpose.msra.mxu0 %v511_v4 }
  0x51   :  { %472 = vmatprep.subr.bf16.mxu0 %v624_v0 }
  0x58   :  { %473 = vmatpush3.bf16.xpose.msra.mxu0 %v512_v5 }
  0x59   :  { %474 = vmatprep.subr.bf16.mxu0 %v624_v0 }
  0x60   :  { %475 = vmatpush3.bf16.xpose.msra.mxu0 %v513_v6 }
  0x61   :  { %476 = vmatprep.subr.bf16.mxu0 %v624_v0 }
  0x68   :  { %477 = vmatpush3.bf16.xpose.msra.mxu0 %v514_v7 }
  0x69   :  { %478 = vmatprep.subr.bf16.mxu0 %v624_v0 }
  0x70   :  { %479 = vmatpush3.bf16.xpose.msra.mxu0 %v515_v8 }
  0x77   :  { %481 = vmatmul.mubr.bf16.vlgmr.msra.gmra.mrb[0].mxu0 %v516_v9 }
 0x14a   :  { %v170_v12 = vpop.f32.mrb[0].mxu0 }
 0x14b   :  { %v698_v13 = vadd.f32 %v433_v10, %v170_v12  ;;  %v482_v14 = vpop.f32.mrb[1].mxu0 }
 0x14c   :  { %v173_v15 = vpop.f32.mrb[2].mxu0 }
 0x14d   :  { %v701_v16 = vmul.f32 %v445_v11, %v698_v13  ;;  %v703_v17 = vadd.f32 %v433_v10, %v173_v15  ;;  %v483_v18 = vpop.f32.mrb[3].mxu0 }
 0x14f   :  { %v197_v19 = vand.u32 2147483647, %v701_v16  ;;  %v200_v20 = vand.u32 2139095040, %v701_v16  ;;  %v708_v21 = vmul.f32 %v445_v11, %v703_v17  ;;  %vm199_vm15 = vcmp.lt.s32.totalorder %v701_v16, 0 }
 0x151   :  { %v201_v22 = vshrl.u32 %v200_v20, 23  ;;  %v204_v23 = vand.u32 8388607, %v197_v19  ;;  %v304_v24 = vand.u32 2139095040, %v708_v21  ;;  %v301_v26 = vand.u32 2147483647, %v708_v21 }
 0x152   :  { %vm198_vm0 = vcmp.le.f32.partialorder %v197_v19, 0.7853982 }
 0x153   :  { %v446_v25 = vadd.s32 4294967169, %v201_v22  ;;  %v305_v27 = vshrl.u32 %v304_v24, 23  ;;  %v205_v29 = vor.u32 8388608, %v204_v23  ;;  %v308_v31 = vand.u32 8388607, %v301_v26 }
 0x155   :  { %v207_v28 = vadd.s32 1, %v446_v25  ;;  %v450_v30 = vadd.s32 4294967169, %v305_v27  ;;  %v716_v36 = vshll.u32 %v205_v29, 8  ;;  %v309_v40 = vor.u32 8388608, %v308_v31 }
 0x157   :  { %vm208_vm1 = vcmp.gt.s32.totalorder %v207_v28, 0  ;;  %v311_v33 = vadd.s32 1, %v450_v30  ;;  %v349_v9 = vshll.u32 %v309_v40, 8 }
 0x158   :  { %v209_v32 = vsel %vm208_vm1, %v207_v28, 0  ;;  %vm303_vm1 = vcmp.lt.s32.totalorder %v708_v21, 0 }
 0x159   :  { %v210_v34 = vshrl.u32 %v209_v32, 5  ;;  %v211_v35 = vand.u32 31, %v209_v32  ;;  %vm312_vm2 = vcmp.gt.s32.totalorder %v311_v33, 0 }
 0x15a   :  { %v313_v59 = vsel %vm312_vm2, %v311_v33, 0  ;;  %vm763_vm2 = vcmp.le.f32.partialorder %v301_v26, 0.7853982 }
 0x15b   :  { %v212_v37 = vsub.s32 32, %v211_v35  ;;  %v214_v39 = vshll.u32 %v626_v38, %v211_v35  ;;  %v217_v42 = vshll.u32 %v627_v41, %v211_v35  ;;  %v220_v44 = vshll.u32 %v628_v43, %v211_v35 }
 0x15c   :  { %v223_v46 = vshll.u32 %v629_v45, %v211_v35  ;;  %v226_v48 = vshll.u32 %v630_v47, %v211_v35  ;;  %vm229_vm3 = vcmp.lt.s32.totalorder %v210_v34, 1  ;;  %vm231_vm4 = vcmp.lt.s32.totalorder %v210_v34, 3 }
 0x15d   :  { %v215_v49 = vshrl.u32 %v627_v41, %v212_v37  ;;  %v218_v50 = vshrl.u32 %v628_v43, %v212_v37  ;;  %v221_v51 = vshrl.u32 %v629_v45, %v212_v37  ;;  %v213_v52 = vshrl.u32 %v626_v38, %v212_v37 }
 0x15e   :  { %v224_v53 = vshrl.u32 %v630_v47, %v212_v37  ;;  %v227_v55 = vshrl.u32 %v631_v54, %v212_v37  ;;  %vm232_vm5 = vcmp.lt.s32.totalorder %v210_v34, 4  ;;  %v315_v62 = vand.u32 31, %v313_v59 }
 0x15f   :  { %v216_v56 = vor.u32 %v215_v49, %v214_v39  ;;  %v219_v57 = vor.u32 %v218_v50, %v217_v42  ;;  %v222_v58 = vor.u32 %v221_v51, %v220_v44  ;;  %vm230_vm6 = vcmp.lt.s32.totalorder %v210_v34, 2 }
 0x160   :  { %v225_v60 = vor.u32 %v224_v53, %v223_v46  ;;  %v228_v61 = vor.u32 %v227_v55, %v226_v48  ;;  %v316_v6 = vsub.s32 32, %v315_v62  ;;  %v314_v14 = vshrl.u32 %v313_v59, 5 }
 0x161   :  { %v233_v63 = vsel %vm229_vm3, %v213_v52, %v216_v56  ;;  %v234_v0 = vsel %vm232_vm5, %v222_v58, 2102212464  ;;  %v237_v1 = vsel %vm229_vm3, %v216_v56, %v219_v57  ;;  %v241_v2 = vsel %vm229_vm3, %v219_v57, %v222_v58 }
 0x162   :  { %v235_v3 = vsel %vm231_vm4, %v219_v57, %v234_v0  ;;  %v238_v4 = vsel %vm232_vm5, %v225_v60, 920167782  ;;  %v242_v5 = vsel %vm232_vm5, %v228_v61, 1326507024  ;;  %v318_v23 = vshll.u32 %v626_v38, %v315_v62 }
 0x163   :  { %v239_v7 = vsel %vm231_vm4, %v222_v58, %v238_v4  ;;  %v243_v8 = vsel %vm231_vm4, %v225_v60, %v242_v5  ;;  %v236_v10 = vsel %vm230_vm6, %v233_v63, %v235_v3  ;;  %v319_v24 = vshrl.u32 %v627_v41, %v316_v6 }
 0x164   :  { %v240_v11 = vsel %vm230_vm6, %v237_v1, %v239_v7  ;;  %v244_v12 = vsel %vm230_vm6, %v241_v2, %v243_v8  ;;  %v321_v25 = vshll.u32 %v627_v41, %v315_v62  ;;  %v322_v27 = vshrl.u32 %v628_v43, %v316_v6 }
 0x165   :  { %v728_v15 = vmul.u32.u64.low %v716_v36, %v244_v12  ;;  %v729_v18 = vmul.u32.u64.high %v716_v36, %v244_v12, %v728_v15  ;;  %v732_v20 = vmul.u32.u64.low %v716_v36, %v240_v11  ;;  %v733_v22 = vmul.u32.u64.high %v716_v36, %v240_v11, %v732_v20 }
 0x166   :  { %v324_v28 = vshll.u32 %v628_v43, %v315_v62  ;;  %v325_v29 = vshrl.u32 %v629_v45, %v316_v6  ;;  %v327_v30 = vshll.u32 %v629_v45, %v315_v62  ;;  %v328_v31 = vshrl.u32 %v630_v47, %v316_v6 }
 0x167   :  { %v320_v32 = vor.u32 %v319_v24, %v318_v23  ;;  %v323_v33 = vor.u32 %v322_v27, %v321_v25  ;;  %v330_v34 = vshll.u32 %v630_v47, %v315_v62  ;;  %v331_v35 = vshrl.u32 %v631_v54, %v316_v6 }
 0x168   :  { %v252_v37 = vmul.u32 %v716_v36, %v236_v10  ;;  %vm254_vm7 = vc.u32 %v729_v18, %v732_v20  ;;  %v255_v39 = vadd.s32 1, %v733_v22  ;;  %v326_v40 = vor.u32 %v325_v29, %v324_v28 }
 0x169   :  { %v317_v42 = vshrl.u32 %v626_v38, %v316_v6  ;;  %v329_v41 = vor.u32 %v328_v31, %v327_v30  ;;  %v332_v44 = vor.u32 %v331_v35, %v330_v34  ;;  %vm333_vm8 = vcmp.lt.s32.totalorder %v314_v14, 1 }
 0x16a   :  { %v256_v43 = vsel %vm254_vm7, %v255_v39, %v733_v22  ;;  %vm335_vm9 = vcmp.lt.s32.totalorder %v314_v14, 3  ;;  %vm336_vm10 = vcmp.lt.s32.totalorder %v314_v14, 4  ;;  %v341_v45 = vsel %vm333_vm8, %v320_v32, %v323_v33 }
 0x16b   :  { %v257_v46 = vadd.s32 %v256_v43, %v252_v37  ;;  %v338_v47 = vsel %vm336_vm10, %v326_v40, 2102212464  ;;  %v342_v48 = vsel %vm336_vm10, %v329_v41, 920167782  ;;  %v345_v36 = vsel %vm333_vm8, %v323_v33, %v326_v40 }
 0x16c   :  { %vm334_vm11 = vcmp.lt.s32.totalorder %v314_v14, 2  ;;  %v337_v49 = vsel %vm333_vm8, %v317_v42, %v320_v32  ;;  %v343_v50 = vsel %vm335_vm9, %v326_v40, %v342_v48  ;;  %v346_v51 = vsel %vm336_vm10, %v332_v44, 1326507024 }
 0x16d   :  { %v258_v52 = vadd.s32 536870912, %v257_v46  ;;  %v339_v53 = vsel %vm335_vm9, %v323_v33, %v338_v47  ;;  %v344_v54 = vsel %vm334_vm11, %v341_v45, %v343_v50  ;;  %v347_v38 = vsel %vm335_vm9, %v329_v41, %v346_v51 }
 0x16e   :  { %v348_v55 = vsel %vm334_vm11, %v345_v36, %v347_v38  ;;  %v743_v56 = vmul.u32.u64.low %v349_v9, %v344_v54  ;;  %v744_v57 = vmul.u32.u64.high %v349_v9, %v344_v54, %v743_v56  ;;  %v340_v61 = vsel %vm334_vm11, %v337_v49, %v339_v53 }
 0x16f   :  { %v259_v58 = vshrl.u32 %v258_v52, 30  ;;  %v746_v59 = vmul.u32.u64.low %v349_v9, %v348_v55  ;;  %v747_v60 = vmul.u32.u64.high %v349_v9, %v348_v55, %v746_v59  ;;  %v356_v1 = vmul.u32 %v349_v9, %v340_v61 }
 0x170   :  { %v359_v63 = vadd.s32 1, %v744_v57  ;;  %v253_v15 = vadd.s32 %v732_v20, %v729_v18  ;;  %vm289_vm6 = vweird.f32 %v701_v16  ;;  %vm393_vm10 = vweird.f32 %v708_v21 }
 0x171   :  { %v260_v62 = vshll.u32 %v259_v58, 30  ;;  %vm358_vm12 = vc.u32 %v747_v60, %v743_v56  ;;  %v283_v39 = vsub.s32 4, %v259_v58  ;;  %v357_v18 = vadd.s32 %v743_v56, %v747_v60  ;;  %v443_v56 = vld [vmem:[#allocation7 + $0x2] ss:$0 sm:$0xff] }
 0x172   :  { %v360_v2 = vsel %vm358_vm12, %v359_v63, %v744_v57  ;;  %v181_v19 = vmul.f32 %v443_v56, %v698_v13  ;;  %v444_v63 = vld [vmem:[#allocation7 + $0x1] ss:$0 sm:$0xff] }
 0x173   :  { %v261_v0 = vsub.s32 %v257_v46, %v260_v62  ;;  %v361_v4 = vadd.s32 %v360_v2, %v356_v1  ;;  %v284_v47 = vsel %vm199_vm15, %v283_v39, %v259_v58 }
 0x174   :  { %v286_v50 = vsel %vm198_vm0, 0, %v284_v47  ;;  %v187_v26 = vadd.f32 %v444_v63, %v181_v19 }
 0x175   :  { %v263_v3 = vsub.s32 0, %v261_v0  ;;  %v362_v6 = vadd.s32 536870912, %v361_v4  ;;  %v290_v54 = vadd.s32 3, %v286_v50 }
 0x177   :  { %v447_v5 = vmin.u32 %v263_v3, %v261_v0  ;;  %v363_v8 = vshrl.u32 %v362_v6, 30  ;;  %v291_v59 = vand.u32 3, %v290_v54  ;;  %v454_v6 = vld [vmem:[#allocation7 + $0x3] ss:$0 sm:$0xff] }
 0x179   :  { %v265_v7 = vclz %v447_v5  ;;  %v364_v11 = vshll.u32 %v363_v8, 30  ;;  %v387_v55 = vsub.s32 4, %v363_v8  ;;  %vm296_vm3 = vcmp.eq.s32.totalorder %v291_v59, 2 }
 0x17a   :  { %vm293_vm4 = vcmp.eq.s32.totalorder %v291_v59, 0  ;;  %vm292_vm5 = vcmp.lt.s32.totalorder %v291_v59, 2 }
 0x17b   :  { %v448_v10 = vadd.s32 4294967294, %v265_v7  ;;  %v365_v14 = vsub.s32 %v361_v4, %v364_v11  ;;  %v388_v61 = vsel %vm303_vm1, %v387_v55, %v363_v8 }
 0x17c   :  { %v390_v4 = vsel %vm763_vm2, 0, %v388_v61 }
 0x17d   :  { %vm449_vm13 = vcmp.lt.s32.totalorder %v448_v10, 0  ;;  %v367_v23 = vsub.s32 0, %v365_v14 }
 0x17e   :  { %v268_v12 = vsel %vm449_vm13, 0, %v448_v10  ;;  %v394_v10 = vadd.s32 3, %v390_v4 }
 0x17f   :  { %v269_v22 = vsub.s32 32, %v268_v12  ;;  %v273_v9 = vsub.s32 4294967266, %v268_v12  ;;  %v270_v24 = vshll.u32 %v261_v0, %v268_v12  ;;  %v451_v28 = vmin.u32 %v367_v23, %v365_v14 }
 0x180   :  { %v189_v12 = vmul.f32 %v187_v26, %v698_v13 }
 0x181   :  { %v271_v25 = vshrl.u32 %v253_v15, %v269_v22  ;;  %v274_v27 = vadd.s32 127, %v273_v9  ;;  %v369_v31 = vclz %v451_v28  ;;  %v395_v22 = vand.u32 3, %v394_v10 }
 0x182   :  { %v182_v9 = vmul.f32 %v443_v56, %v703_v17 }
 0x183   :  { %v272_v29 = vor.u32 %v271_v25, %v270_v24  ;;  %v275_v30 = vshll.u32 %v274_v27, 23  ;;  %v452_v33 = vadd.s32 4294967294, %v369_v31  ;;  %vm400_vm7 = vcmp.eq.s32.totalorder %v395_v22, 2 }
 0x184   :  { %v188_v28 = vadd.f32 %v444_v63, %v182_v9  ;;  %vm397_vm8 = vcmp.eq.s32.totalorder %v395_v22, 0  ;;  %vm396_vm9 = vcmp.lt.s32.totalorder %v395_v22, 2 }
 0x185   :  { %v276_v32 = vor.u32 4788187, %v275_v30  ;;  %v279_v35 = vcvt.s32.f32 %v272_v29  ;;  %vm453_vm14 = vcmp.lt.s32.totalorder %v452_v33, 0 }
 0x186   :  { %v372_v40 = vsel %vm453_vm14, 0, %v452_v33  ;;  %v190_v31 = vmul.f32 %v188_v28, %v703_v17 }
 0x187   :  { %v277_v34 = vand.u32 2147483647, %v276_v32  ;;  %v373_v20 = vsub.s32 32, %v372_v40  ;;  %v377_v42 = vsub.s32 4294967266, %v372_v40  ;;  %v374_v44 = vshll.u32 %v365_v14, %v372_v40 }
 0x189   :  { %v280_v37 = vmul.f32 %v279_v35, %v277_v34  ;;  %v375_v43 = vshrl.u32 %v357_v18, %v373_v20  ;;  %v378_v45 = vadd.s32 127, %v377_v42 }
 0x18b   :  { %v281_v41 = vxor.u32 2147483648, %v280_v37  ;;  %v376_v36 = vor.u32 %v375_v43, %v374_v44  ;;  %v379_v49 = vshll.u32 %v378_v45, 23 }
 0x18d   :  { %v282_v46 = vsel %vm199_vm15, %v281_v41, %v280_v37  ;;  %v380_v51 = vor.u32 4788187, %v379_v49  ;;  %v383_v53 = vcvt.s32.f32 %v376_v36 }
 0x18e   :  { %v285_v48 = vsel %vm198_vm0, %v701_v16, %v282_v46 }
 0x18f   :  { %517 = vcosq.f32 %v285_v48  ;;  %v381_v52 = vand.u32 2147483647, %v380_v51 }
 0x190   :  { %519 = vsinq.f32 %v285_v48 }
 0x191   :  { %v384_v38 = vmul.f32 %v383_v53, %v381_v52 }
 0x193   :  { %v385_v57 = vxor.u32 2147483648, %v384_v38 }
 0x195   :  { %v386_v60 = vsel %vm303_vm1, %v385_v57, %v384_v38 }
 0x196   :  { %v389_v0 = vsel %vm763_vm2, %v708_v21, %v386_v60 }
 0x197   :  { %521 = vcosq.f32 %v389_v0 }
 0x198   :  { %523 = vsinq.f32 %v389_v0 }
 0x199   :  { %v518_v62 = vpop.eup %517 }
 0x19a   :  { %v520_v1 = vpop.eup %519  ;;  %v297_v2 = vxor.u32 2147483648, %v518_v62 }
 0x19b   :  { %v294_v3 = vxor.u32 2147483648, %v520_v1 }
 0x19c   :  { %v298_v5 = vsel %vm296_vm3, %v297_v2, %v520_v1 }
 0x19d   :  { %v295_v7 = vsel %vm293_vm4, %v518_v62, %v294_v3 }
 0x19e   :  { %v299_v8 = vsel %vm292_vm5, %v295_v7, %v298_v5 }
 0x19f   :  { %v300_v11 = vsel %vm289_vm6, nan, %v299_v8 }
 0x1a0   :  { %v409_v14 = vmul.f32 %v454_v6, %v300_v11 }
 0x1a1   :  { %v522_v23 = vpop.eup %521 }
 0x1a2   :  { %v411_v15 = vadd.f32 %v409_v14, %v189_v12  ;;  %v524_v24 = vpop.eup %523  ;;  %v401_v25 = vxor.u32 2147483648, %v522_v23 }
 0x1a3   :  { %v398_v27 = vxor.u32 2147483648, %v524_v24 }
 0x1a4   :  { %413 = vst [vmem:[#allocation8] sm:$0xff] %v411_v15  ;;  %v402_v29 = vsel %vm400_vm7, %v401_v25, %v524_v24 }
 0x1a5   :  { %v399_v16 = vsel %vm397_vm8, %v522_v23, %v398_v27 }
 0x1a6   :  { %v403_v30 = vsel %vm396_vm9, %v399_v16, %v402_v29 }
 0x1a7   :  { %v404_v13 = vsel %vm393_vm10, nan, %v403_v30 }
 0x1a8   :  { %v410_v32 = vmul.f32 %v454_v6, %v404_v13 }
 0x1aa   :  { %v412_v33 = vadd.f32 %v410_v32, %v190_v31 }
 0x1ac   :  { %414 = vst [vmem:[#allocation8 + $0x8] sm:$0xff] %v412_v33 }
 0x1ad   :  { %602 = shalt.err (!%p599_p0)
}
 0x1ae   :  { %s603_s25 = scalar_lea.hbm %s792_s3, 256 }
 0x1af   :  { %p604_p1 = scmp.ne.s32.totalorder %s792_s3, %s603_s25  ;;  %p607_p2 = scmp.lt.u32.totalorder %s603_s25, %s792_s3 }
 0x1b1   :  { %p609_p3 = pnand %p607_p2, %p604_p1 }
 0x1b3   :  { %612 = shalt.err (!%p609_p3)
}
 0x1b4   :  { %s633_s30 = smov 128   ;;  %s634_s4 = smov 8  }
 0x1b5   :  { %426 = dma.vmem_to_hbm [thread:$0]  %s421_s21, 256, %s792_s3, [#allocation4], %s633_s30, %s633_s30, %s634_s4  }
 0x1b6   :  { %617 = dma.done.wait [#allocation4], 256  }
 0x1b7   :  { %618 = vsyncadd [#allocation4], 4294967040 }
 0x1b8   :  { %430 = vsyncpa [#allocation3], 1 }
 0x1b9   :  { %431 = vsyncpa [#allocation6], 1 }
 0x1ba   :  { %432 = vsyncpa [#allocation4], 1 }

// kernel: tpu_custom_call.1
= control target key start
LH: loop header
LB: loop body
LE: loop exit
PB: predicated region body
PF: predicated region fallthrough
CT: control target
= control target key end

     0   :  { %8 = vsyncpa [#allocation3], 0  ;;  %s789_s0 = inlined_call_operand.hbm [shape: bf16[16,128], index: 0, kind: input, shape index: {}]   ;;  %s790_s1 = inlined_call_operand.hbm [shape: bf16[128,128], index: 1, kind: input, shape index: {}]   ;;  %s791_s2 = inlined_call_operand.hbm [shape: f32[8,128], index: 2, kind: input, shape index: {}]   ;;  %s792_s3 = inlined_call_operand.hbm [shape: f32[16,128], index: 3, kind: output, shape index: {}]  }
   0x1   :  { %9 = vsyncpa [#allocation6], 0 }
   0x2   :  { %10 = vsyncpa [#allocation4], 0  ;;  %s619_s12 = smov [#allocation5]   ;;  %s620_s14 = smov [#allocation2]  }
   0x3   :  { %s28_s13 = sshll.u32 %s619_s12, 4  ;;  %s16_s15 = sshll.u32 %s620_s14, 4  ;;  %s29_s13 = int_to_ptr.vmem [resolvable:$true] %s28_s13  ;;  %s655_s15 = int_to_ptr.vmem [resolvable:$true] %s16_s15 }
   0x4   :  { %s525_s18 = scalar_lea.hbm %s790_s1, 1024 }
   0x5   :  { %p526_p0 = scmp.ne.s32.totalorder %s790_s1, %s525_s18  ;;  %p529_p1 = scmp.lt.u32.totalorder %s525_s18, %s790_s1 }
   0x7   :  { %p531_p2 = pnand %p529_p1, %p526_p0 }
   0x9   :  { %534 = shalt.err (!%p531_p2)
}
   0xa   :  { %s535_s23 = scalar_lea.vmem %s29_s13, 1024  ;;  %p540_p4 = scmp.lt.s32.totalorder %s29_s13, %s29_s13 }
   0xb   :  { %p536_p3 = scmp.ne.s32.totalorder %s29_s13, %s535_s23  ;;  %p541_p5 = scmp.lt.s32.totalorder %s535_s23, %s535_s23 }
   0xd   :  { %p542_p6 = por %p541_p5, %p540_p4 }
   0xf   :  { %p543_p7 = pnand %p542_p6, %p536_p3 }
  0x11   :  { %546 = shalt.err (!%p543_p7)
}
  0x12   :  { %s621_s24 = smov 64   ;;  %s622_s25 = smov 4  }
  0x13   :  { %34 = dma.hbm_to_vmem [thread:$0]  %s790_s1, 1024, %s29_s13, [#allocation6], %s621_s24, %s621_s24, %s622_s25  }
  0x14   :  { %s547_s30 = scalar_lea.hbm %s789_s0, 128 }
  0x15   :  { %p548_p8 = scmp.ne.s32.totalorder %s789_s0, %s547_s30  ;;  %p551_p9 = scmp.lt.u32.totalorder %s547_s30, %s789_s0 }
  0x17   :  { %p553_p10 = pnand %p551_p9, %p548_p8 }
  0x19   :  { %556 = shalt.err (!%p553_p10)
}
  0x1a   :  { %s557_s8 = scalar_lea.vmem %s655_s15, 128  ;;  %p562_p12 = scmp.lt.s32.totalorder %s655_s15, %s655_s15 }
  0x1b   :  { %p558_p11 = scmp.ne.s32.totalorder %s655_s15, %s557_s8  ;;  %p563_p13 = scmp.lt.s32.totalorder %s557_s8, %s557_s8 }
  0x1d   :  { %p564_p0 = por %p563_p13, %p562_p12 }
  0x1f   :  { %p565_p1 = pnand %p564_p0, %p558_p11 }
  0x21   :  { %568 = shalt.err (!%p565_p1)
}
  0x22   :  { %22 = dma.hbm_to_vmem [thread:$0]  %s789_s0, 128, %s655_s15, [#allocation3], %s621_s24, %s621_s24, %s622_s25  }
  0x23   :  { %s623_s10 = smov [#allocation7]   ;;  %s569_s14 = scalar_lea.hbm %s791_s2, 128 }
  0x24   :  { %s41_s11 = sshll.u32 %s623_s10, 4  ;;  %p570_p2 = scmp.ne.s32.totalorder %s791_s2, %s569_s14  ;;  %s42_s11 = int_to_ptr.vmem [resolvable:$true] %s41_s11 }
  0x25   :  { %p573_p3 = scmp.lt.u32.totalorder %s569_s14, %s791_s2 }
  0x27   :  { %p575_p4 = pnand %p573_p3, %p570_p2 }
  0x29   :  { %578 = shalt.err (!%p575_p4)
}
  0x2a   :  { %s579_s20 = scalar_lea.vmem %s42_s11, 128  ;;  %p584_p6 = scmp.lt.s32.totalorder %s42_s11, %s42_s11 }
  0x2b   :  { %p580_p5 = scmp.ne.s32.totalorder %s42_s11, %s579_s20  ;;  %p585_p7 = scmp.lt.s32.totalorder %s579_s20, %s579_s20 }
  0x2d   :  { %p586_p8 = por %p585_p7, %p584_p6 }
  0x2f   :  { %p587_p9 = pnand %p586_p8, %p580_p5 }
  0x31   :  { %590 = shalt.err (!%p587_p9)
}
  0x32   :  { %44 = dma.hbm_to_vmem [thread:$0]  %s791_s2, 128, %s42_s11, [#allocation6]  }
  0x33   :  { %613 = dma.done.wait [#allocation3], 128  }
  0x34   :  { %614 = vsyncadd [#allocation3], 4294967168 }
  0x35   :  { %615 = dma.done.wait [#allocation6], 1152  }
  0x36   :  { %616 = vsyncadd [#allocation6], 4294966144  ;;  %v624_v0 = vmov 0.0   ;;  %vm625_vm0 = vmmov 0   ;;  %v508_v1 = vld [vmem:[#allocation5] sm:$0xff]   ;;  %v509_v2 = vld [vmem:[#allocation5 + $0x8] sm:$0xff]  }
  0x37   :  { %464 = vmatprep.subr.bf16.mxu0 %v624_v0  ;;  %480 = vmatprep.mubr.msk.bf16.mxu0 %vm625_vm0, %v624_v0  ;;  %v510_v3 = vld [vmem:[#allocation5 + $0x10] sm:$0xff]   ;;  %v511_v4 = vld [vmem:[#allocation5 + $0x18] sm:$0xff]   ;;  %v512_v5 = vld [vmem:[#allocation5 + $0x20] sm:$0xff]   ;;  %v626_v38 = vmov 683565275   ;;  %s632_s2 = smov [#allocation8]  }
  0x38   :  { %465 = vmatpush3.bf16.xpose.msra.mxu0 %v508_v1  ;;  %v513_v6 = vld [vmem:[#allocation5 + $0x28] sm:$0xff]   ;;  %v514_v7 = vld [vmem:[#allocation5 + $0x30] sm:$0xff]   ;;  %v515_v8 = vld [vmem:[#allocation5 + $0x38] sm:$0xff]   ;;  %v627_v41 = vmov 2475754826   ;;  %s420_s21 = sshll.u32 %s632_s2, 4  ;;  %s421_s21 = int_to_ptr.vmem [resolvable:$true] %s420_s21 }
  0x39   :  { %466 = vmatprep.subr.bf16.mxu0 %v624_v0  ;;  %v516_v9 = vld [vmem:[#allocation2] sm:$0xff]   ;;  %v433_v10 = vld [vmem:[#allocation7] ss:$0 sm:$0xff]  ;;  %v445_v11 = vld [vmem:[#allocation7 + $0x4] ss:$0 sm:$0xff]  ;;  %s591_s22 = scalar_lea.vmem %s421_s21, 256  ;;  %p596_p11 = scmp.lt.s32.totalorder %s421_s21, %s421_s21 }
  0x3a   :  { %v628_v43 = vmov 2131351028   ;;  %v629_v45 = vmov 2102212464   ;;  %v630_v47 = vmov 920167782   ;;  %p592_p10 = scmp.ne.s32.totalorder %s421_s21, %s591_s22  ;;  %p597_p12 = scmp.lt.s32.totalorder %s591_s22, %s591_s22 }
  0x3b   :  { %v631_v54 = vmov 1326507024  }
  0x3c   :  { %p598_p13 = por %p597_p12, %p596_p11 }
  0x3e   :  { %p599_p0 = pnand %p598_p13, %p592_p10 }
  0x40   :  { %467 = vmatpush3.bf16.xpose.msra.mxu0 %v509_v2 }
  0x41   :  { %468 = vmatprep.subr.bf16.mxu0 %v624_v0 }
  0x48   :  { %469 = vmatpush3.bf16.xpose.msra.mxu0 %v510_v3 }
  0x49   :  { %470 = vmatprep.subr.bf16.mxu0 %v624_v0 }
  0x50   :  { %471 = vmatpush3.bf16.xpose.msra.mxu0 %v511_v4 }
  0x51   :  { %472 = vmatprep.subr.bf16.mxu0 %v624_v0 }
  0x58   :  { %473 = vmatpush3.bf16.xpose.msra.mxu0 %v512_v5 }
  0x59   :  { %474 = vmatprep.subr.bf16.mxu0 %v624_v0 }
  0x60   :  { %475 = vmatpush3.bf16.xpose.msra.mxu0 %v513_v6 }
  0x61   :  { %476 = vmatprep.subr.bf16.mxu0 %v624_v0 }
  0x68   :  { %477 = vmatpush3.bf16.xpose.msra.mxu0 %v514_v7 }
  0x69   :  { %478 = vmatprep.subr.bf16.mxu0 %v624_v0 }
  0x70   :  { %479 = vmatpush3.bf16.xpose.msra.mxu0 %v515_v8 }
  0x77   :  { %481 = vmatmul.mubr.bf16.vlgmr.msra.gmra.mrb[0].mxu0 %v516_v9 }
 0x14a   :  { %v170_v12 = vpop.f32.mrb[0].mxu0 }
 0x14b   :  { %v698_v13 = vadd.f32 %v433_v10, %v170_v12  ;;  %v482_v14 = vpop.f32.mrb[1].mxu0 }
 0x14c   :  { %v173_v15 = vpop.f32.mrb[2].mxu0 }
 0x14d   :  { %v701_v16 = vmul.f32 %v445_v11, %v698_v13  ;;  %v703_v17 = vadd.f32 %v433_v10, %v173_v15  ;;  %v483_v18 = vpop.f32.mrb[3].mxu0 }
 0x14f   :  { %v197_v19 = vand.u32 2147483647, %v701_v16  ;;  %v200_v20 = vand.u32 2139095040, %v701_v16  ;;  %v708_v21 = vmul.f32 %v445_v11, %v703_v17  ;;  %vm199_vm15 = vcmp.lt.s32.totalorder %v701_v16, 0 }
 0x151   :  { %v201_v22 = vshrl.u32 %v200_v20, 23  ;;  %v204_v23 = vand.u32 8388607, %v197_v19  ;;  %v304_v24 = vand.u32 2139095040, %v708_v21  ;;  %v301_v26 = vand.u32 2147483647, %v708_v21 }
 0x152   :  { %vm198_vm0 = vcmp.le.f32.partialorder %v197_v19, 0.7853982 }
 0x153   :  { %v446_v25 = vadd.s32 4294967169, %v201_v22  ;;  %v305_v27 = vshrl.u32 %v304_v24, 23  ;;  %v205_v29 = vor.u32 8388608, %v204_v23  ;;  %v308_v31 = vand.u32 8388607, %v301_v26 }
 0x155   :  { %v207_v28 = vadd.s32 1, %v446_v25  ;;  %v450_v30 = vadd.s32 4294967169, %v305_v27  ;;  %v716_v36 = vshll.u32 %v205_v29, 8  ;;  %v309_v40 = vor.u32 8388608, %v308_v31 }
 0x157   :  { %vm208_vm1 = vcmp.gt.s32.totalorder %v207_v28, 0  ;;  %v311_v33 = vadd.s32 1, %v450_v30  ;;  %v349_v9 = vshll.u32 %v309_v40, 8 }
 0x158   :  { %v209_v32 = vsel %vm208_vm1, %v207_v28, 0  ;;  %vm303_vm1 = vcmp.lt.s32.totalorder %v708_v21, 0 }
 0x159   :  { %v210_v34 = vshrl.u32 %v209_v32, 5  ;;  %v211_v35 = vand.u32 31, %v209_v32  ;;  %vm312_vm2 = vcmp.gt.s32.totalorder %v311_v33, 0 }
 0x15a   :  { %v313_v59 = vsel %vm312_vm2, %v311_v33, 0  ;;  %vm763_vm2 = vcmp.le.f32.partialorder %v301_v26, 0.7853982 }
 0x15b   :  { %v212_v37 = vsub.s32 32, %v211_v35  ;;  %v214_v39 = vshll.u32 %v626_v38, %v211_v35  ;;  %v217_v42 = vshll.u32 %v627_v41, %v211_v35  ;;  %v220_v44 = vshll.u32 %v628_v43, %v211_v35 }
 0x15c   :  { %v223_v46 = vshll.u32 %v629_v45, %v211_v35  ;;  %v226_v48 = vshll.u32 %v630_v47, %v211_v35  ;;  %vm229_vm3 = vcmp.lt.s32.totalorder %v210_v34, 1  ;;  %vm231_vm4 = vcmp.lt.s32.totalorder %v210_v34, 3 }
 0x15d   :  { %v215_v49 = vshrl.u32 %v627_v41, %v212_v37  ;;  %v218_v50 = vshrl.u32 %v628_v43, %v212_v37  ;;  %v221_v51 = vshrl.u32 %v629_v45, %v212_v37  ;;  %v213_v52 = vshrl.u32 %v626_v38, %v212_v37 }
 0x15e   :  { %v224_v53 = vshrl.u32 %v630_v47, %v212_v37  ;;  %v227_v55 = vshrl.u32 %v631_v54, %v212_v37  ;;  %vm232_vm5 = vcmp.lt.s32.totalorder %v210_v34, 4  ;;  %v315_v62 = vand.u32 31, %v313_v59 }
 0x15f   :  { %v216_v56 = vor.u32 %v215_v49, %v214_v39  ;;  %v219_v57 = vor.u32 %v218_v50, %v217_v42  ;;  %v222_v58 = vor.u32 %v221_v51, %v220_v44  ;;  %vm230_vm6 = vcmp.lt.s32.totalorder %v210_v34, 2 }
 0x160   :  { %v225_v60 = vor.u32 %v224_v53, %v223_v46  ;;  %v228_v61 = vor.u32 %v227_v55, %v226_v48  ;;  %v316_v6 = vsub.s32 32, %v315_v62  ;;  %v314_v14 = vshrl.u32 %v313_v59, 5 }
 0x161   :  { %v233_v63 = vsel %vm229_vm3, %v213_v52, %v216_v56  ;;  %v234_v0 = vsel %vm232_vm5, %v222_v58, 2102212464  ;;  %v237_v1 = vsel %vm229_vm3, %v216_v56, %v219_v57  ;;  %v241_v2 = vsel %vm229_vm3, %v219_v57, %v222_v58 }
 0x162   :  { %v235_v3 = vsel %vm231_vm4, %v219_v57, %v234_v0  ;;  %v238_v4 = vsel %vm232_vm5, %v225_v60, 920167782  ;;  %v242_v5 = vsel %vm232_vm5, %v228_v61, 1326507024  ;;  %v318_v23 = vshll.u32 %v626_v38, %v315_v62 }
 0x163   :  { %v239_v7 = vsel %vm231_vm4, %v222_v58, %v238_v4  ;;  %v243_v8 = vsel %vm231_vm4, %v225_v60, %v242_v5  ;;  %v236_v10 = vsel %vm230_vm6, %v233_v63, %v235_v3  ;;  %v319_v24 = vshrl.u32 %v627_v41, %v316_v6 }
 0x164   :  { %v240_v11 = vsel %vm230_vm6, %v237_v1, %v239_v7  ;;  %v244_v12 = vsel %vm230_vm6, %v241_v2, %v243_v8  ;;  %v321_v25 = vshll.u32 %v627_v41, %v315_v62  ;;  %v322_v27 = vshrl.u32 %v628_v43, %v316_v6 }
 0x165   :  { %v728_v15 = vmul.u32.u64.low %v716_v36, %v244_v12  ;;  %v729_v18 = vmul.u32.u64.high %v716_v36, %v244_v12, %v728_v15  ;;  %v732_v20 = vmul.u32.u64.low %v716_v36, %v240_v11  ;;  %v733_v22 = vmul.u32.u64.high %v716_v36, %v240_v11, %v732_v20 }
 0x166   :  { %v324_v28 = vshll.u32 %v628_v43, %v315_v62  ;;  %v325_v29 = vshrl.u32 %v629_v45, %v316_v6  ;;  %v327_v30 = vshll.u32 %v629_v45, %v315_v62  ;;  %v328_v31 = vshrl.u32 %v630_v47, %v316_v6 }
 0x167   :  { %v320_v32 = vor.u32 %v319_v24, %v318_v23  ;;  %v323_v33 = vor.u32 %v322_v27, %v321_v25  ;;  %v330_v34 = vshll.u32 %v630_v47, %v315_v62  ;;  %v331_v35 = vshrl.u32 %v631_v54, %v316_v6 }
 0x168   :  { %v252_v37 = vmul.u32 %v716_v36, %v236_v10  ;;  %vm254_vm7 = vc.u32 %v729_v18, %v732_v20  ;;  %v255_v39 = vadd.s32 1, %v733_v22  ;;  %v326_v40 = vor.u32 %v325_v29, %v324_v28 }
 0x169   :  { %v317_v42 = vshrl.u32 %v626_v38, %v316_v6  ;;  %v329_v41 = vor.u32 %v328_v31, %v327_v30  ;;  %v332_v44 = vor.u32 %v331_v35, %v330_v34  ;;  %vm333_vm8 = vcmp.lt.s32.totalorder %v314_v14, 1 }
 0x16a   :  { %v256_v43 = vsel %vm254_vm7, %v255_v39, %v733_v22  ;;  %vm335_vm9 = vcmp.lt.s32.totalorder %v314_v14, 3  ;;  %vm336_vm10 = vcmp.lt.s32.totalorder %v314_v14, 4  ;;  %v341_v45 = vsel %vm333_vm8, %v320_v32, %v323_v33 }
 0x16b   :  { %v257_v46 = vadd.s32 %v256_v43, %v252_v37  ;;  %v338_v47 = vsel %vm336_vm10, %v326_v40, 2102212464  ;;  %v342_v48 = vsel %vm336_vm10, %v329_v41, 920167782  ;;  %v345_v36 = vsel %vm333_vm8, %v323_v33, %v326_v40 }
 0x16c   :  { %vm334_vm11 = vcmp.lt.s32.totalorder %v314_v14, 2  ;;  %v337_v49 = vsel %vm333_vm8, %v317_v42, %v320_v32  ;;  %v343_v50 = vsel %vm335_vm9, %v326_v40, %v342_v48  ;;  %v346_v51 = vsel %vm336_vm10, %v332_v44, 1326507024 }
 0x16d   :  { %v258_v52 = vadd.s32 536870912, %v257_v46  ;;  %v339_v53 = vsel %vm335_vm9, %v323_v33, %v338_v47  ;;  %v344_v54 = vsel %vm334_vm11, %v341_v45, %v343_v50  ;;  %v347_v38 = vsel %vm335_vm9, %v329_v41, %v346_v51 }
 0x16e   :  { %v348_v55 = vsel %vm334_vm11, %v345_v36, %v347_v38  ;;  %v743_v56 = vmul.u32.u64.low %v349_v9, %v344_v54  ;;  %v744_v57 = vmul.u32.u64.high %v349_v9, %v344_v54, %v743_v56  ;;  %v340_v61 = vsel %vm334_vm11, %v337_v49, %v339_v53 }
 0x16f   :  { %v259_v58 = vshrl.u32 %v258_v52, 30  ;;  %v746_v59 = vmul.u32.u64.low %v349_v9, %v348_v55  ;;  %v747_v60 = vmul.u32.u64.high %v349_v9, %v348_v55, %v746_v59  ;;  %v356_v1 = vmul.u32 %v349_v9, %v340_v61 }
 0x170   :  { %v359_v63 = vadd.s32 1, %v744_v57  ;;  %v253_v15 = vadd.s32 %v732_v20, %v729_v18  ;;  %vm289_vm6 = vweird.f32 %v701_v16  ;;  %vm393_vm10 = vweird.f32 %v708_v21 }
 0x171   :  { %v260_v62 = vshll.u32 %v259_v58, 30  ;;  %vm358_vm12 = vc.u32 %v747_v60, %v743_v56  ;;  %v283_v39 = vsub.s32 4, %v259_v58  ;;  %v357_v18 = vadd.s32 %v743_v56, %v747_v60  ;;  %v443_v56 = vld [vmem:[#allocation7 + $0x2] ss:$0 sm:$0xff] }
 0x172   :  { %v360_v2 = vsel %vm358_vm12, %v359_v63, %v744_v57  ;;  %v181_v19 = vmul.f32 %v443_v56, %v698_v13  ;;  %v444_v63 = vld [vmem:[#allocation7 + $0x1] ss:$0 sm:$0xff] }
 0x173   :  { %v261_v0 = vsub.s32 %v257_v46, %v260_v62  ;;  %v361_v4 = vadd.s32 %v360_v2, %v356_v1  ;;  %v284_v47 = vsel %vm199_vm15, %v283_v39, %v259_v58 }
 0x174   :  { %v286_v50 = vsel %vm198_vm0, 0, %v284_v47  ;;  %v187_v26 = vadd.f32 %v444_v63, %v181_v19 }
 0x175   :  { %v263_v3 = vsub.s32 0, %v261_v0  ;;  %v362_v6 = vadd.s32 536870912, %v361_v4  ;;  %v290_v54 = vadd.s32 3, %v286_v50 }
 0x177   :  { %v447_v5 = vmin.u32 %v263_v3, %v261_v0  ;;  %v363_v8 = vshrl.u32 %v362_v6, 30  ;;  %v291_v59 = vand.u32 3, %v290_v54  ;;  %v454_v6 = vld [vmem:[#allocation7 + $0x3] ss:$0 sm:$0xff] }
 0x179   :  { %v265_v7 = vclz %v447_v5  ;;  %v364_v11 = vshll.u32 %v363_v8, 30  ;;  %v387_v55 = vsub.s32 4, %v363_v8  ;;  %vm296_vm3 = vcmp.eq.s32.totalorder %v291_v59, 2 }
 0x17a   :  { %vm293_vm4 = vcmp.eq.s32.totalorder %v291_v59, 0  ;;  %vm292_vm5 = vcmp.lt.s32.totalorder %v291_v59, 2 }
 0x17b   :  { %v448_v10 = vadd.s32 4294967294, %v265_v7  ;;  %v365_v14 = vsub.s32 %v361_v4, %v364_v11  ;;  %v388_v61 = vsel %vm303_vm1, %v387_v55, %v363_v8 }
 0x17c   :  { %v390_v4 = vsel %vm763_vm2, 0, %v388_v61 }
 0x17d   :  { %vm449_vm13 = vcmp.lt.s32.totalorder %v448_v10, 0  ;;  %v367_v23 = vsub.s32 0, %v365_v14 }
 0x17e   :  { %v268_v12 = vsel %vm449_vm13, 0, %v448_v10  ;;  %v394_v10 = vadd.s32 3, %v390_v4 }
 0x17f   :  { %v269_v22 = vsub.s32 32, %v268_v12  ;;  %v273_v9 = vsub.s32 4294967266, %v268_v12  ;;  %v270_v24 = vshll.u32 %v261_v0, %v268_v12  ;;  %v451_v28 = vmin.u32 %v367_v23, %v365_v14 }
 0x180   :  { %v189_v12 = vmul.f32 %v187_v26, %v698_v13 }
 0x181   :  { %v271_v25 = vshrl.u32 %v253_v15, %v269_v22  ;;  %v274_v27 = vadd.s32 127, %v273_v9  ;;  %v369_v31 = vclz %v451_v28  ;;  %v395_v22 = vand.u32 3, %v394_v10 }
 0x182   :  { %v182_v9 = vmul.f32 %v443_v56, %v703_v17 }
 0x183   :  { %v272_v29 = vor.u32 %v271_v25, %v270_v24  ;;  %v275_v30 = vshll.u32 %v274_v27, 23  ;;  %v452_v33 = vadd.s32 4294967294, %v369_v31  ;;  %vm400_vm7 = vcmp.eq.s32.totalorder %v395_v22, 2 }
 0x184   :  { %v188_v28 = vadd.f32 %v444_v63, %v182_v9  ;;  %vm397_vm8 = vcmp.eq.s32.totalorder %v395_v22, 0  ;;  %vm396_vm9 = vcmp.lt.s32.totalorder %v395_v22, 2 }
 0x185   :  { %v276_v32 = vor.u32 4788187, %v275_v30  ;;  %v279_v35 = vcvt.s32.f32 %v272_v29  ;;  %vm453_vm14 = vcmp.lt.s32.totalorder %v452_v33, 0 }
 0x186   :  { %v372_v40 = vsel %vm453_vm14, 0, %v452_v33  ;;  %v190_v31 = vmul.f32 %v188_v28, %v703_v17 }
 0x187   :  { %v277_v34 = vand.u32 2147483647, %v276_v32  ;;  %v373_v20 = vsub.s32 32, %v372_v40  ;;  %v377_v42 = vsub.s32 4294967266, %v372_v40  ;;  %v374_v44 = vshll.u32 %v365_v14, %v372_v40 }
 0x189   :  { %v280_v37 = vmul.f32 %v279_v35, %v277_v34  ;;  %v375_v43 = vshrl.u32 %v357_v18, %v373_v20  ;;  %v378_v45 = vadd.s32 127, %v377_v42 }
 0x18b   :  { %v281_v41 = vxor.u32 2147483648, %v280_v37  ;;  %v376_v36 = vor.u32 %v375_v43, %v374_v44  ;;  %v379_v49 = vshll.u32 %v378_v45, 23 }
 0x18d   :  { %v282_v46 = vsel %vm199_vm15, %v281_v41, %v280_v37  ;;  %v380_v51 = vor.u32 4788187, %v379_v49  ;;  %v383_v53 = vcvt.s32.f32 %v376_v36 }
 0x18e   :  { %v285_v48 = vsel %vm198_vm0, %v701_v16, %v282_v46 }
 0x18f   :  { %517 = vcosq.f32 %v285_v48  ;;  %v381_v52 = vand.u32 2147483647, %v380_v51 }
 0x190   :  { %519 = vsinq.f32 %v285_v48 }
 0x191   :  { %v384_v38 = vmul.f32 %v383_v53, %v381_v52 }
 0x193   :  { %v385_v57 = vxor.u32 2147483648, %v384_v38 }
 0x195   :  { %v386_v60 = vsel %vm303_vm1, %v385_v57, %v384_v38 }
 0x196   :  { %v389_v0 = vsel %vm763_vm2, %v708_v21, %v386_v60 }
 0x197   :  { %521 = vcosq.f32 %v389_v0 }
 0x198   :  { %523 = vsinq.f32 %v389_v0 }
 0x199   :  { %v518_v62 = vpop.eup %517 }
 0x19a   :  { %v520_v1 = vpop.eup %519  ;;  %v297_v2 = vxor.u32 2147483648, %v518_v62 }
 0x19b   :  { %v294_v3 = vxor.u32 2147483648, %v520_v1 }
 0x19c   :  { %v298_v5 = vsel %vm296_vm3, %v297_v2, %v520_v1 }
 0x19d   :  { %v295_v7 = vsel %vm293_vm4, %v518_v62, %v294_v3 }
 0x19e   :  { %v299_v8 = vsel %vm292_vm5, %v295_v7, %v298_v5 }
 0x19f   :  { %v300_v11 = vsel %vm289_vm6, nan, %v299_v8 }
 0x1a0   :  { %v409_v14 = vmul.f32 %v454_v6, %v300_v11 }
 0x1a1   :  { %v522_v23 = vpop.eup %521 }
 0x1a2   :  { %v411_v15 = vadd.f32 %v409_v14, %v189_v12  ;;  %v524_v24 = vpop.eup %523  ;;  %v401_v25 = vxor.u32 2147483648, %v522_v23 }
 0x1a3   :  { %v398_v27 = vxor.u32 2147483648, %v524_v24 }
 0x1a4   :  { %413 = vst [vmem:[#allocation8] sm:$0xff] %v411_v15  ;;  %v402_v29 = vsel %vm400_vm7, %v401_v25, %v524_v24 }
 0x1a5   :  { %v399_v16 = vsel %vm397_vm8, %v522_v23, %v398_v27 }
 0x1a6   :  { %v403_v30 = vsel %vm396_vm9, %v399_v16, %v402_v29 }
 0x1a7   :  { %v404_v13 = vsel %vm393_vm10, nan, %v403_v30 }
 0x1a8   :  { %v410_v32 = vmul.f32 %v454_v6, %v404_v13 }
 0x1aa   :  { %v412_v33 = vadd.f32 %v410_v32, %v190_v31 }
 0x1ac   :  { %414 = vst [vmem:[#allocation8 + $0x8] sm:$0xff] %v412_v33 }
 0x1ad   :  { %602 = shalt.err (!%p599_p0)
}
 0x1ae   :  { %s603_s25 = scalar_lea.hbm %s792_s3, 256 }
 0x1af   :  { %p604_p1 = scmp.ne.s32.totalorder %s792_s3, %s603_s25  ;;  %p607_p2 = scmp.lt.u32.totalorder %s603_s25, %s792_s3 }
 0x1b1   :  { %p609_p3 = pnand %p607_p2, %p604_p1 }
 0x1b3   :  { %612 = shalt.err (!%p609_p3)
}
 0x1b4   :  { %s633_s30 = smov 128   ;;  %s634_s4 = smov 8  }
 0x1b5   :  { %426 = dma.vmem_to_hbm [thread:$0]  %s421_s21, 256, %s792_s3, [#allocation4], %s633_s30, %s633_s30, %s634_s4  }
 0x1b6   :  { %617 = dma.done.wait [#allocation4], 256  }
 0x1b7   :  { %618 = vsyncadd [#allocation4], 4294967040 }
 0x1b8   :  { %430 = vsyncpa [#allocation3], 1 }
 0x1b9   :  { %431 = vsyncpa [#allocation6], 1 }
 0x1ba   :  { %432 = vsyncpa [#allocation4], 1 }

</bundles_post_ra>
